<compile_context>
chip_gen: v6e
topology: v6e:2x2x1
jax: 0.10.0
libtpu: 0.0.40
codegen_flags: <defaults>
</compile_context>

<pallas_src>
import functools

import jax
import jax.numpy as jnp
from jax.experimental import pallas as pl
from jax.experimental.pallas import tpu as pltpu

KH = KW = 4
STRIDE = 2
PAD = 1


def _cdiv(a, b):
    return -(-a // b)


def _round_up(a, b):
    return _cdiv(a, b) * b


def _conv_phase_kernel(xm_ref, xh_ref, w_ref, b_ref, o_ref, *, tm, halo, offsets):
    """One (batch, M-tile, phase) grid step of the fused k4/s2/p1 conv.

    xm_ref: (1, 1, tm,   C)  main input tile of the current phase (bf16)
    xh_ref: (1, 1, halo, C)  look-ahead rows directly following the main tile
    w_ref : (1, 4, C, N)     the 4 tap weights of this phase (bf16, (Cin, Cout))
    b_ref : (1, N)           bias (f32)
    o_ref : (1, tm, N)       output tile, revisited across the 4 phases (f32 acc)
    """
    t = pl.program_id(2)  # phase index == reduction axis

    # Stitch the tile with its halo so all 4 shifted taps are static slices.
    x = jnp.concatenate([xm_ref[0, 0], xh_ref[0, 0]], axis=0)  # (tm+halo, C)

    acc = jnp.dot(x[offsets[0]:offsets[0] + tm], w_ref[0, 0],
                  preferred_element_type=jnp.float32)
    for s in range(1, 4):
        off = offsets[s]
        acc = acc + jnp.dot(x[off:off + tm], w_ref[0, s],
                            preferred_element_type=jnp.float32)

    @pl.when(t == 0)
    def _():
        o_ref[0] = (acc + b_ref[...]).astype(o_ref.dtype)

    @pl.when(t != 0)
    def _():
        o_ref[0] = o_ref[0] + acc.astype(o_ref.dtype)


def _pick_tile(Mv, C, N, halo, tm_cap, vmem_budget):
    """Largest halo-multiple tile under the VMEM budget, then shrink to Mv/n_m
    so the M round-up waste stays small."""
    def est(tm):  # conservative per-step VMEM bytes (double-buffered pipeline)
        return (2 * tm * C * 2          # main input tile, bf16, x2
                + 2 * halo * C * 2      # halo tile, x2
                + 2 * 4 * C * N * 2     # per-phase weights, x2
                + 2 * N * 4             # bias, x2
                + 2 * tm * N * 4        # output tile (f32 accumulator), x2
                + tm * N * 4            # in-kernel f32 temp
                + (1 << 20))            # compiler scratch slack

    cap = max(halo, (tm_cap // halo) * halo)
    while cap > halo and est(cap) > vmem_budget:
        cap -= halo
    n_m = _cdiv(Mv, cap)
    tm = _round_up(_cdiv(Mv, n_m), halo)   # multiple of halo, <= cap
    return tm, n_m


def downsample_flatten(x, weight, bias, *, compute_dtype=jnp.bfloat16,
                       tm_cap=2048, vmem_limit_bytes=48 * 1024 * 1024):
    """x: [B, Cin, H, W] (NCHW), weight: [Cout, Cin, 4, 4], bias: [Cout]."""
    B, C, H, W = x.shape
    N = weight.shape[0]
    assert weight.shape == (N, C, KH, KW)
    assert H % 2 == 0 and W % 2 == 0, "k=4/s=2/p=1 downsample expects even H, W"

    Ho, Wo = H // 2, W // 2
    Wp = Wo + 1                 # phase row length (incl. one halo column)
    Mv = Ho * Wp                # valid (padded-width) flattened output length
    halo = _round_up(Wo + 2, 8)  # look-ahead rows needed for the +1 shifts

    tm, n_m = _pick_tile(Mv, C, N, halo, tm_cap,
                         vmem_limit_bytes - 8 * 1024 * 1024)
    m_pad = n_m * tm

    # Single pad pass: conv halo (1 top/left) + enough extra zero rows that
    # every shifted input tile (incl. the M round-up tail) stays in bounds.
    rows = max(Ho + 1, _cdiv(m_pad + halo, Wp))   # rows per phase
    pad_bottom = 2 * rows - H - 1
    xp = jnp.pad(x.astype(compute_dtype),
                 ((0, 0), (0, 0), (1, pad_bottom), (1, 1)))  # (B, C, 2*rows, 2*Wp)

    # 4-phase space-to-depth, channel-minor, flattened spatial:
    #   phases[2*p + q, b, i*Wp + j, c] == x_pad[b, c, 2*i + p, 2*j + q]
    phases = (xp.reshape(B, C, rows, 2, Wp, 2)
                .transpose(3, 5, 0, 2, 4, 1)
                .reshape(4, B, rows * Wp, C))

    # Per-phase tap weights: (4 phases, 4 shifts, Cin, Cout), bf16.
    w_taps = jnp.stack(
        [jnp.stack([weight[:, :, 2 * dh + p, 2 * dw + q].transpose(1, 0)
                    for (dh, dw) in ((0, 0), (0, 1), (1, 0), (1, 1))], axis=0)
         for (p, q) in ((0, 0), (0, 1), (1, 0), (1, 1))],
        axis=0).astype(compute_dtype)
    b2 = bias.reshape(1, N).astype(jnp.float32)

    offsets = (0, 1, Wp, Wp + 1)       # in-tile start of each of the 4 shifts
    halo_blocks_per_tile = tm // halo  # exact: tm is a multiple of halo

    kernel = functools.partial(_conv_phase_kernel, tm=tm, halo=halo,
                               offsets=offsets)

    out_flat = pl.pallas_call(
        kernel,
        out_shape=jax.ShapeDtypeStruct((B, m_pad, N), x.dtype),
        grid_spec=pltpu.PrefetchScalarGridSpec(
            num_scalar_prefetch=0,
            grid=(B, n_m, 4),
            in_specs=[
                # main tile of the current phase
                pl.BlockSpec((1, 1, tm, C), lambda b, m, t: (t, b, m, 0)),
                # halo rows immediately after the main tile (same array)
                pl.BlockSpec((1, 1, halo, C),
                             lambda b, m, t: (t, b,
                                              (m + 1) * halo_blocks_per_tile, 0)),
                # 4 tap weights of this phase
                pl.BlockSpec((1, 4, C, N), lambda b, m, t: (t, 0, 0, 0)),
                # bias (constant block)
                pl.BlockSpec((1, N), lambda b, m, t: (0, 0)),
            ],
            out_specs=pl.BlockSpec((1, tm, N), lambda b, m, t: (b, m, 0)),
        ),
        compiler_params=pltpu.CompilerParams(
            dimension_semantics=("parallel", "parallel", "arbitrary"),
            vmem_limit_bytes=vmem_limit_bytes,
        ),
    )(phases, phases, w_taps, b2)

    # Drop the per-row halo column and the M round-up tail; reorder to NCHW.
    out = (out_flat[:, :Mv, :]
           .reshape(B, Ho, Wp, N)[:, :, :Wo, :]
           .transpose(0, 3, 1, 2))
    return out


if __name__ == "__main__":
    key = jax.random.PRNGKey(0)
    B, Cin, H, W = 2, 4, 16, 16
    Cout = 8

    kx, kw, kb = jax.random.split(key, 3)
    x = jax.random.normal(kx, (B, Cin, H, W), dtype=jnp.float32)

    # Deterministic "PyTorch-like" init (uniform in +-1/sqrt(fan_in))
    fan_in = Cin * KH * KW
    bound = 1.0 / (fan_in ** 0.5)
    weight = jax.random.uniform(kw, (Cout, Cin, KH, KW), jnp.float32, -bound, bound)
    bias = jax.random.uniform(kb, (Cout,), jnp.float32, -bound, bound)

    out = downsample_flatten(x, weight, bias)
    out = jax.block_until_ready(out)

    # Reference check against XLA conv (NCHW, OIHW); bf16 MXU inputs -> looser tol.
    ref = jax.lax.conv_general_dilated(
        x, weight, window_strides=(STRIDE, STRIDE),
        padding=((PAD, PAD), (PAD, PAD)),
        dimension_numbers=("NCHW", "OIHW", "NCHW"),
    ) + bias.reshape(1, Cout, 1, 1)

    assert out.shape == (B, Cout, H // 2, W // 2), out.shape
    max_err = float(jnp.max(jnp.abs(out - ref)))
    assert jnp.allclose(out, ref, atol=5e-2, rtol=5e-2), (
        f"mismatch vs reference conv (max abs err {max_err})")
    print("KERNEL_OK")
</pallas_src>

<mosaic_0001>
module attributes {stable_mosaic.version = 11 : i64} {
  func.func @_conv_phase_kernel(%arg0: i32, %arg1: i32, %arg2: i32, %arg3: memref<1x1x80x4xbf16, #tpu.memory_space<vmem>>, %arg4: memref<1x1x16x4xbf16, #tpu.memory_space<vmem>>, %arg5: memref<1x4x4x8xbf16, #tpu.memory_space<vmem>>, %arg6: memref<1x8xf32, #tpu.memory_space<vmem>>, %arg7: memref<1x80x8xf32, #tpu.memory_space<vmem>>) attributes {dimension_semantics = [#tpu.dimension_semantics<parallel>, #tpu.dimension_semantics<parallel>, #tpu.dimension_semantics<arbitrary>], iteration_bounds = array<i64: 2, 1, 4>, scalar_prefetch = 0 : i64, scratch_operands = 0 : i64, tpu.core_type = #tpu.core_type<tc>, window_params = [{transform_indices = @transform_0, window_bounds = array<i64: 1, 1, 80, 4>}, {transform_indices = @transform_1, window_bounds = array<i64: 1, 1, 16, 4>}, {transform_indices = @transform_2, window_bounds = array<i64: 1, 4, 4, 8>}, {pipeline_mode = #tpu.pipeline_mode<synchronous>, transform_indices = @transform_3, window_bounds = array<i64: 1, 8>}, {transform_indices = @transform_4, window_bounds = array<i64: 1, 80, 8>}]} {
    %c0 = arith.constant 0 : index
    %c0_0 = arith.constant 0 : index
    %c0_1 = arith.constant 0 : index
    %c0_2 = arith.constant 0 : index
    %0 = vector.load %arg3[%c0, %c0_0, %c0_1, %c0_2] : memref<1x1x80x4xbf16, #tpu.memory_space<vmem>>, vector<1x1x80x4xbf16>
    %1 = vector.shape_cast %0 : vector<1x1x80x4xbf16> to vector<80x4xbf16>
    %c0_3 = arith.constant 0 : index
    %c0_4 = arith.constant 0 : index
    %c0_5 = arith.constant 0 : index
    %c0_6 = arith.constant 0 : index
    %2 = vector.load %arg4[%c0_3, %c0_4, %c0_5, %c0_6] : memref<1x1x16x4xbf16, #tpu.memory_space<vmem>>, vector<1x1x16x4xbf16>
    %3 = vector.shape_cast %2 : vector<1x1x16x4xbf16> to vector<16x4xbf16>
    %4 = tpu.concatenate %1, %3 in 0 : vector<80x4xbf16>, vector<16x4xbf16> -> vector<96x4xbf16>
    %5 = vector.extract_strided_slice %4 {offsets = [0, 0], sizes = [80, 4], strides = [1, 1]} : vector<96x4xbf16> to vector<80x4xbf16>
    %c0_7 = arith.constant 0 : index
    %c0_8 = arith.constant 0 : index
    %c0_9 = arith.constant 0 : index
    %c0_10 = arith.constant 0 : index
    %6 = vector.load %arg5[%c0_7, %c0_8, %c0_9, %c0_10] : memref<1x4x4x8xbf16, #tpu.memory_space<vmem>>, vector<1x1x4x8xbf16>
    %7 = vector.shape_cast %6 : vector<1x1x4x8xbf16> to vector<4x8xbf16>
    %cst = arith.constant dense<0.000000e+00> : vector<80x8xf32>
    %8 = tpu.matmul %5, %7, %cst {dimension_numbers = #tpu.dot_dimension_numbers<[1], [0], [0], [1], [0, 0, 1, 1], [], []>} : vector<80x4xbf16>, vector<4x8xbf16>, vector<80x8xf32> -> vector<80x8xf32>
    %9 = vector.extract_strided_slice %4 {offsets = [1, 0], sizes = [80, 4], strides = [1, 1]} : vector<96x4xbf16> to vector<80x4xbf16>
    %c0_11 = arith.constant 0 : index
    %c1 = arith.constant 1 : index
    %c0_12 = arith.constant 0 : index
    %c0_13 = arith.constant 0 : index
    %10 = vector.load %arg5[%c0_11, %c1, %c0_12, %c0_13] : memref<1x4x4x8xbf16, #tpu.memory_space<vmem>>, vector<1x1x4x8xbf16>
    %11 = vector.shape_cast %10 : vector<1x1x4x8xbf16> to vector<4x8xbf16>
    %cst_14 = arith.constant dense<0.000000e+00> : vector<80x8xf32>
    %12 = tpu.matmul %9, %11, %cst_14 {dimension_numbers = #tpu.dot_dimension_numbers<[1], [0], [0], [1], [0, 0, 1, 1], [], []>} : vector<80x4xbf16>, vector<4x8xbf16>, vector<80x8xf32> -> vector<80x8xf32>
    %13 = arith.addf %8, %12 : vector<80x8xf32>
    %14 = vector.extract_strided_slice %4 {offsets = [9, 0], sizes = [80, 4], strides = [1, 1]} : vector<96x4xbf16> to vector<80x4xbf16>
    %c0_15 = arith.constant 0 : index
    %c2 = arith.constant 2 : index
    %c0_16 = arith.constant 0 : index
    %c0_17 = arith.constant 0 : index
    %15 = vector.load %arg5[%c0_15, %c2, %c0_16, %c0_17] : memref<1x4x4x8xbf16, #tpu.memory_space<vmem>>, vector<1x1x4x8xbf16>
    %16 = vector.shape_cast %15 : vector<1x1x4x8xbf16> to vector<4x8xbf16>
    %cst_18 = arith.constant dense<0.000000e+00> : vector<80x8xf32>
    %17 = tpu.matmul %14, %16, %cst_18 {dimension_numbers = #tpu.dot_dimension_numbers<[1], [0], [0], [1], [0, 0, 1, 1], [], []>} : vector<80x4xbf16>, vector<4x8xbf16>, vector<80x8xf32> -> vector<80x8xf32>
    %18 = arith.addf %13, %17 : vector<80x8xf32>
    %19 = vector.extract_strided_slice %4 {offsets = [10, 0], sizes = [80, 4], strides = [1, 1]} : vector<96x4xbf16> to vector<80x4xbf16>
    %c0_19 = arith.constant 0 : index
    %c3 = arith.constant 3 : index
    %c0_20 = arith.constant 0 : index
    %c0_21 = arith.constant 0 : index
    %20 = vector.load %arg5[%c0_19, %c3, %c0_20, %c0_21] : memref<1x4x4x8xbf16, #tpu.memory_space<vmem>>, vector<1x1x4x8xbf16>
    %21 = vector.shape_cast %20 : vector<1x1x4x8xbf16> to vector<4x8xbf16>
    %cst_22 = arith.constant dense<0.000000e+00> : vector<80x8xf32>
    %22 = tpu.matmul %19, %21, %cst_22 {dimension_numbers = #tpu.dot_dimension_numbers<[1], [0], [0], [1], [0, 0, 1, 1], [], []>} : vector<80x4xbf16>, vector<4x8xbf16>, vector<80x8xf32> -> vector<80x8xf32>
    %23 = arith.addf %18, %22 : vector<80x8xf32>
    %c0_i32 = arith.constant 0 : i32
    %24 = arith.cmpi eq, %arg2, %c0_i32 : i32
    %25 = arith.extui %24 : i1 to i32
    %c0_i32_23 = arith.constant 0 : i32
    %26 = arith.cmpi ne, %25, %c0_i32_23 : i32
    scf.if %26 {
      %c0_26 = arith.constant 0 : index
      %c0_27 = arith.constant 0 : index
      %30 = vector.load %arg6[%c0_26, %c0_27] : memref<1x8xf32, #tpu.memory_space<vmem>>, vector<1x8xf32>
      %31 = vector.broadcast %30 : vector<1x8xf32> to vector<80x8xf32>
      %32 = arith.addf %23, %31 : vector<80x8xf32>
      %c0_28 = arith.constant 0 : index
      %c0_29 = arith.constant 0 : index
      %c0_30 = arith.constant 0 : index
      %33 = vector.load %arg7[%c0_28, %c0_29, %c0_30] : memref<1x80x8xf32, #tpu.memory_space<vmem>>, vector<1x80x8xf32>
      %34 = vector.shape_cast %33 : vector<1x80x8xf32> to vector<80x8xf32>
      %35 = vector.shape_cast %32 : vector<80x8xf32> to vector<1x80x8xf32>
      tpu.vector_store %arg7[%c0_28, %c0_29, %c0_30], %35 {strides = array<i32>} : memref<1x80x8xf32, #tpu.memory_space<vmem>>, vector<1x80x8xf32>,
    } else {
    }
    %c0_i32_24 = arith.constant 0 : i32
    %27 = arith.cmpi ne, %arg2, %c0_i32_24 : i32
    %28 = arith.extui %27 : i1 to i32
    %c0_i32_25 = arith.constant 0 : i32
    %29 = arith.cmpi ne, %28, %c0_i32_25 : i32
    scf.if %29 {
      %c0_26 = arith.constant 0 : index
      %c0_27 = arith.constant 0 : index
      %c0_28 = arith.constant 0 : index
      %30 = vector.load %arg7[%c0_26, %c0_27, %c0_28] : memref<1x80x8xf32, #tpu.memory_space<vmem>>, vector<1x80x8xf32>
      %31 = vector.shape_cast %30 : vector<1x80x8xf32> to vector<80x8xf32>
      %32 = arith.addf %31, %23 : vector<80x8xf32>
      %c0_29 = arith.constant 0 : index
      %c0_30 = arith.constant 0 : index
      %c0_31 = arith.constant 0 : index
      %33 = vector.load %arg7[%c0_29, %c0_30, %c0_31] : memref<1x80x8xf32, #tpu.memory_space<vmem>>, vector<1x80x8xf32>
      %34 = vector.shape_cast %33 : vector<1x80x8xf32> to vector<80x8xf32>
      %35 = vector.shape_cast %32 : vector<80x8xf32> to vector<1x80x8xf32>
      tpu.vector_store %arg7[%c0_29, %c0_30, %c0_31], %35 {strides = array<i32>} : memref<1x80x8xf32, #tpu.memory_space<vmem>>, vector<1x80x8xf32>,
    } else {
    }
    return
  }
  func.func @transform_0(%arg0: i32, %arg1: i32, %arg2: i32) -> (i32, i32, i32, i32) {
    %c0_i32 = arith.constant 0 : i32
    %c0_i32_0 = arith.constant 0 : i32
    return %arg2, %arg0, %arg1, %c0_i32 : i32, i32, i32, i32
  }
  func.func @transform_1(%arg0: i32, %arg1: i32, %arg2: i32) -> (i32, i32, i32, i32) {
    %c1_i32 = arith.constant 1 : i32
    %0 = arith.addi %arg1, %c1_i32 : i32
    %c5_i32 = arith.constant 5 : i32
    %1 = arith.muli %0, %c5_i32 : i32
    %c0_i32 = arith.constant 0 : i32
    %c0_i32_0 = arith.constant 0 : i32
    return %arg2, %arg0, %1, %c0_i32 : i32, i32, i32, i32
  }
  func.func @transform_2(%arg0: i32, %arg1: i32, %arg2: i32) -> (i32, i32, i32, i32) {
    %c0_i32 = arith.constant 0 : i32
    %c0_i32_0 = arith.constant 0 : i32
    %c0_i32_1 = arith.constant 0 : i32
    %c0_i32_2 = arith.constant 0 : i32
    return %arg2, %c0_i32, %c0_i32_0, %c0_i32_1 : i32, i32, i32, i32
  }
  func.func @transform_3(%arg0: i32, %arg1: i32, %arg2: i32) -> (i32, i32) {
    %c0_i32 = arith.constant 0 : i32
    %c0_i32_0 = arith.constant 0 : i32
    %c0_i32_1 = arith.constant 0 : i32
    return %c0_i32, %c0_i32_0 : i32, i32
  }
  func.func @transform_4(%arg0: i32, %arg1: i32, %arg2: i32) -> (i32, i32, i32) {
    %c0_i32 = arith.constant 0 : i32
    %c0_i32_0 = arith.constant 0 : i32
    return %arg0, %arg1, %c0_i32 : i32, i32, i32
  }
}

</mosaic_0001>

<bundles_post_ra>
// kernel: tpu_custom_call.1
= control target key start
LH: loop header
LB: loop body
LE: loop exit
PB: predicated region body
PF: predicated region fallthrough
CT: control target
= control target key end

     0   :  { %s1373_s15 = smov 0   ;;  %s1375_s16 = smov 0   ;;  %s1662_s0 = inlined_call_operand.vmem [shape: bf16[4,2,99,4], index: 0, kind: input, shape index: {}]   ;;  %s1663_s1 = inlined_call_operand.vmem [shape: bf16[4,2,99,4], index: 1, kind: input, shape index: {}]   ;;  %s1664_s2 = inlined_call_operand.vmem [shape: bf16[4,4,4,8], index: 2, kind: input, shape index: {}]   ;;  %s1665_s3 = inlined_call_operand.vmem [shape: f32[1,8], index: 3, kind: input, shape index: {}]   ;;  %s1666_s4 = inlined_call_operand.vmem [shape: f32[2,80,8], index: 4, kind: output, shape index: {}]  }
   0x1   :  { %s1377_s17 = smov 0   ;;  %s1379_s18 = smov 0  }
   0x2   :  { %s1381_s19 = smov 0  }
   0x3 LB: > { %s26_s20 = sadd.s32 1, %s1336_s17  ;;  %s33_s21 = sadd.s32 1, %s1340_s18  ;;  %s1344_s19 = sphi %s1381_s19, %s14_s19   ;;  %s1340_s18 = sphi %s1379_s18, %s1670_s18   ;;  %s1336_s17 = sphi %s1377_s17, %s1669_s17   ;;  %s1332_s16 = sphi %s1375_s16, %s1668_s16   ;;  %s1328_s15 = sphi %s1373_s15, %s1667_s15  }
   0x4   : > { %p27_p0 = scmp.ge.s32.totalorder %s26_s20, 4  ;;  %p1102_p1 = scmp.ge.s32.totalorder %s1344_s19, 1 }
   0x5   : > { %p253_p2 = scmp.lt.s32.totalorder %s1344_s19, 9 }
   0x6   : > { %s1672_s20 = smov (%p27_p0, %s26_s20), 0  ;;  %s1674_s21 = smov (!%p27_p0, %s33_s21), %s1340_s18 }
   0x7   : > { %p254_p3 = pnand %p1102_p1, %p253_p2  ;;  %p35_p4 = scmp.ge.s32.totalorder %s1674_s21, 2 }
   0x8   : > { %p324_p5 = scmp.lt.s32.totalorder (!%p254_p3), %s1328_s15, 3  ;;  %p326_p6 = scmp.lt.s32.totalorder (!%p254_p3), %s1332_s16, 1 }
   0x9   : > { %s1676_s21 = smov (%p35_p4, %s1674_s21), 0  ;;  %257 = sbr.rel (%p254_p3) target bundleno = 325 (0x145), region = 36 }
   0xa   : > { %p1137_p7 = scmp.ne.s32.totalorder (!%p254_p3), %s1328_s15, 0 }
   0xe   : > { %v1346_v0 = vmov 0.0   ;;  %vm1347_vm0 = vmmov 0   ;;  %s325_s22 = scalar_select %p324_p5, %s1328_s15, 3  ;;  %vm489_vm1 = vcmask 1041408   ;;  %vm473_vm2 = vcmask 31744  }
   0xf   : > { %1189 = vmatprep.subr.bf16.mxu1 %v1346_v0  ;;  %1191 = vmatprep.mubr.msk.bf16.mxu1 %vm1347_vm0, %v1346_v0  ;;  %s1678_s16 = smov (!%p326_p6, %s1332_s16), 1  ;;  %vm428_vm3 = vsmask.f32 7424  ;;  %vm783_vm4 = vcmask 1042432   ;;  %vm654_vm5 = vsmask.f32 3328 }
  0x10   : > { %1167 = vmatprep.subr.bf16.mxu0 %v1346_v0  ;;  %1169 = vmatprep.mubr.msk.bf16.mxu0 %vm1347_vm0, %v1346_v0  ;;  %s1256_s23 = smul.u32 26, %s325_s22  ;;  %s1142_s24 = sshll.u32 %s325_s22, 3 }
  0x11   : > { %s1255_s25 = smul.u32 13, %s1678_s16  ;;  %s1416_s28 = scalar_lea.vmem %s1664_s2, %s1142_s24 }
  0x12   : > { %s1257_s29 = smul.u32 80, %s1678_s16  ;;  %v425_v1 = vld [vmem:[%s1416_s28] sm:$0x3]  ;;  %v1114_v2 = vld [vmem:[%s1416_s28 + $0x2] sm:$0x3] }
  0x13   : > { %s333_s30 = sadd.s32 %s1256_s23, %s1255_s25  ;;  %s355_s5 = sadd.s32 10, %s1255_s25  ;;  %v577_v3 = vsel %vm489_vm1, %v425_v1, 0  ;;  %v491_v4 = vsel %vm489_vm1, %v1114_v2, 0  ;;  %v1131_v5 = vld [vmem:[%s1416_s28 + $0x6] sm:$0x3] }
  0x14   : > { %s1103_s6 = sshll.u32 %s333_s30, 2  ;;  %s357_s7 = sadd.s32 %s1256_s23, %s355_s5  ;;  %1190 = vmatpush3.bf16.msra.mxu1 %v577_v3  ;;  %1168 = vmatpush3.bf16.msra.mxu0 %v491_v4  ;;  %v811_v7 = vsel %vm489_vm1, %v1131_v5, 0  ;;  %v1125_v14 = vld [vmem:[%s1416_s28 + $0x4] sm:$0x3] }
  0x15   : > { %s1426_s10 = scalar_lea.vmem %s1662_s0, %s1103_s6  ;;  %s1104_s11 = sshll.u32 %s357_s7, 2  ;;  %1211 = vmatprep.subr.bf16.mxu0 %v1346_v0  ;;  %1233 = vmatprep.subr.bf16.mxu1 %v1346_v0  ;;  %v696_v19 = vsel %vm489_vm1, %v1125_v14, 0 }
  0x16   : > { %s1433_s14 = scalar_lea.vmem %s1663_s1, %s1104_s11  ;;  %s1438_s23 = scalar_lea.vmem %s1666_s4, %s1257_s29  ;;  %v1441_v6 = vld [vmem:[%s1426_s10] sm:$0xff]   ;;  %v1447_v8 = vld [vmem:[%s1426_s10 + $0x8] sm:$0xff]   ;;  %v1454_v11 = vld [vmem:[%s1426_s10 + $0x10] sm:$0xff]  }
  0x17   : > { %1192 = vmatmul.mubr.msk.bf16.vlgmr.msra.gmra.mxu1 %vm473_vm2, %v1441_v6  ;;  %v430_v9 = vshrl.u32 %v1441_v6, 16  ;;  %v432_v10 = vshll.u32 %v1441_v6, 16  ;;  %v437_v12 = vshll.u32 %v1447_v8, 16  ;;  %v441_v17 = vshrl.u32 %v1447_v8, 16  ;;  %v1468_v23 = vld [vmem:[%s1426_s10 + $0x18] sm:$0xff]   ;;  %v1483_v29 = vld [vmem:[%s1426_s10 + $0x20] sm:$0xff]  }
  0x18   : > { %1234 = vmatpush3.bf16.msra.mxu1 %v811_v7  ;;  %1195 = vmatprep.mubr.msk.bf16.mxu1 %vm1347_vm0, %v1346_v0  ;;  %v445_v18 = vshll.u32 %v1454_v11, 16  ;;  %v449_v25 = vshrl.u32 %v1454_v11, 16  ;;  %v453_v26 = vshll.u32 %v1468_v23, 16  ;;  %v457_v31 = vshrl.u32 %v1468_v23, 16  ;;  %v1492_v33 = vld [vmem:[%s1433_s14] sm:$0xff]  }
  0x19   : > { %v434_v13 = vrot.slane %v432_v10, 1  ;;  %v439_v15 = vrot.slane %v437_v12, 1  ;;  %v461_v32 = vshll.u32 %v1483_v29, 16  ;;  %v465_v37 = vshrl.u32 %v1483_v29, 16 }
  0x1a   : > { %v447_v22 = vrot.slane %v445_v18, 1  ;;  %v455_v28 = vrot.slane %v453_v26, 1  ;;  %v469_v38 = vshll.u32 %v1492_v33, 16  ;;  %v784_v41 = vrot.slane %v1441_v6, 5 }
  0x1b   : > { %v435_v16 = vor.u32 %v434_v13, %v430_v9  ;;  %v443_v21 = vor.u32 %v441_v17, %v439_v15  ;;  %v463_v35 = vrot.slane %v461_v32, 1  ;;  %v785_v42 = vrot.slane %v1447_v8, 5 }
  0x1c   : > { %v451_v27 = vor.u32 %v449_v25, %v447_v22  ;;  %v459_v34 = vor.u32 %v457_v31, %v455_v28  ;;  %v471_v40 = vrot.slane %v469_v38, 1  ;;  %v655_v43 = vrot.slane %v430_v9, 4 }
  0x1d   : > { %v440_v20 = vsel %vm428_vm3, %v435_v16, %v439_v15  ;;  %v448_v24 = vsel %vm428_vm3, %v443_v21, %v447_v22  ;;  %v467_v39 = vor.u32 %v465_v37, %v463_v35  ;;  %v656_v44 = vrot.slane %v432_v10, 5 }
  0x1e   : > { %1170 = vmatmul.mubr.msk.bf16.vlgmr.msra.gmra.mxu0 %vm473_vm2, %v440_v20  ;;  %v456_v30 = vsel %vm428_vm3, %v451_v27, %v455_v28  ;;  %v464_v36 = vsel %vm428_vm3, %v459_v34, %v463_v35  ;;  %v659_v45 = vrot.slane %v437_v12, 5  ;;  %v658_v46 = vrot.slane %v441_v17, 4 }
  0x1f   : > { %1196 = vmatmul.mubr.msk.bf16.gmra.mxu1 %vm473_vm2, %v1447_v8  ;;  %1212 = vmatpush3.bf16.msra.mxu0 %v696_v19  ;;  %v472_v47 = vsel %vm428_vm3, %v467_v39, %v471_v40  ;;  %v786_v48 = vsel %vm783_vm4, %v784_v41, %v785_v42  ;;  %v657_v49 = vor.u32 %v656_v44, %v655_v43  ;;  %v787_v51 = vrot.slane %v1454_v11, 5 }
  0x20   : > { %1173 = vmatprep.mubr.msk.bf16.mxu0 %vm1347_vm0, %v1346_v0  ;;  %1199 = vmatprep.mubr.msk.bf16.mxu1 %vm1347_vm0, %v1346_v0  ;;  %v660_v50 = vor.u32 %v659_v45, %v658_v46  ;;  %v662_v54 = vrot.slane %v449_v25, 4  ;;  %v663_v55 = vrot.slane %v445_v18, 5  ;;  %v789_v57 = vrot.slane %v1468_v23, 5 }
  0x21   : > { %v788_v53 = vsel %vm783_vm4, %v785_v42, %v787_v51  ;;  %v666_v60 = vrot.slane %v457_v31, 4  ;;  %v667_v61 = vrot.slane %v453_v26, 5  ;;  %v791_v63 = vrot.slane %v1483_v29, 5 }
  0x22   : > { %v661_v52 = vsel %vm654_vm5, %v657_v49, %v660_v50  ;;  %v664_v56 = vor.u32 %v663_v55, %v662_v54  ;;  %v790_v59 = vsel %vm783_vm4, %v787_v51, %v789_v57  ;;  %v670_v3 = vrot.slane %v465_v37, 4 }
  0x23   : > { %v668_v62 = vor.u32 %v667_v61, %v666_v60  ;;  %v792_v2 = vsel %vm783_vm4, %v789_v57, %v791_v63  ;;  %v671_v4 = vrot.slane %v461_v32, 5  ;;  %v793_v6 = vrot.slane %v1492_v33, 5 }
  0x24   : > { %v665_v58 = vsel %vm654_vm5, %v660_v50, %v664_v56  ;;  %v674_v7 = vshrl.u32 %v1492_v33, 16 }
  0x25   : > { %v669_v1 = vsel %vm654_vm5, %v664_v56, %v668_v62  ;;  %v672_v5 = vor.u32 %v671_v4, %v670_v3  ;;  %v794_v9 = vsel %vm783_vm4, %v791_v63, %v793_v6 }
  0x26   : > { %1174 = vmatmul.mubr.msk.bf16.gmra.mxu0 %vm473_vm2, %v448_v24  ;;  %v676_v10 = vrot.slane %v674_v7, 4 }
  0x27   : > { %1200 = vmatmul.mubr.msk.bf16.gmra.mxu1 %vm473_vm2, %v1454_v11  ;;  %1177 = vmatprep.mubr.msk.bf16.mxu0 %vm1347_vm0, %v1346_v0  ;;  %v673_v8 = vsel %vm654_vm5, %v668_v62, %v672_v5  ;;  %v677_v11 = vrot.slane %v469_v38, 5 }
  0x28   : > { %1203 = vmatprep.mubr.msk.bf16.mxu1 %vm1347_vm0, %v1346_v0 }
  0x29   : > { %v678_v12 = vor.u32 %v677_v11, %v676_v10 }
  0x2b   : > { %v679_v13 = vsel %vm654_vm5, %v672_v5, %v678_v12 }
  0x2e   : > { %1178 = vmatmul.mubr.msk.bf16.gmra.mxu0 %vm473_vm2, %v456_v30 }
  0x2f   : > { %1204 = vmatmul.mubr.msk.bf16.gmra.mxu1 %vm473_vm2, %v1468_v23  ;;  %1181 = vmatprep.mubr.msk.bf16.mxu0 %vm1347_vm0, %v1346_v0 }
  0x30   : > { %1207 = vmatprep.mubr.msk.bf16.mxu1 %vm1347_vm0, %v1346_v0 }
  0x36   : > { %1182 = vmatmul.mubr.msk.bf16.gmra.mxu0 %vm473_vm2, %v464_v36 }
  0x37   : > { %1208 = vmatmul.mubr.msk.bf16.gmra.mxu1 %vm473_vm2, %v1483_v29  ;;  %1185 = vmatprep.mubr.msk.bf16.mxu0 %vm1347_vm0, %v1346_v0 }
  0x38   : > { %1235 = vmatprep.mubr.msk.bf16.mxu1 %vm1347_vm0, %v1346_v0 }
  0x3e   : > { %1186 = vmatmul.mubr.msk.bf16.gmra.mxu0 %vm473_vm2, %v472_v47 }
  0x3f   : > { %1236 = vmatmul.mubr.msk.bf16.vlgmr.msra.gmra.mxu1 %vm473_vm2, %v786_v48  ;;  %1213 = vmatprep.mubr.msk.bf16.mxu0 %vm1347_vm0, %v1346_v0 }
  0x40   : > { %1239 = vmatprep.mubr.msk.bf16.mxu1 %vm1347_vm0, %v1346_v0 }
  0x46   : > { %1214 = vmatmul.mubr.msk.bf16.vlgmr.msra.gmra.mxu0 %vm473_vm2, %v661_v52 }
  0x47   : > { %1240 = vmatmul.mubr.msk.bf16.gmra.mxu1 %vm473_vm2, %v788_v53  ;;  %1217 = vmatprep.mubr.msk.bf16.mxu0 %vm1347_vm0, %v1346_v0 }
  0x48   : > { %1243 = vmatprep.mubr.msk.bf16.mxu1 %vm1347_vm0, %v1346_v0 }
  0x4e   : > { %1218 = vmatmul.mubr.msk.bf16.gmra.mxu0 %vm473_vm2, %v665_v58 }
  0x4f   : > { %1244 = vmatmul.mubr.msk.bf16.gmra.mxu1 %vm473_vm2, %v790_v59  ;;  %1221 = vmatprep.mubr.msk.bf16.mxu0 %vm1347_vm0, %v1346_v0 }
  0x50   : > { %1247 = vmatprep.mubr.msk.bf16.mxu1 %vm1347_vm0, %v1346_v0 }
  0x56   : > { %1222 = vmatmul.mubr.msk.bf16.gmra.mxu0 %vm473_vm2, %v669_v1 }
  0x57   : > { %1248 = vmatmul.mubr.msk.bf16.gmra.mxu1 %vm473_vm2, %v792_v2  ;;  %1225 = vmatprep.mubr.msk.bf16.mxu0 %vm1347_vm0, %v1346_v0 }
  0x58   : > { %1251 = vmatprep.mubr.msk.bf16.mxu1 %vm1347_vm0, %v1346_v0 }
  0x5e   : > { %1226 = vmatmul.mubr.msk.bf16.gmra.mxu0 %vm473_vm2, %v673_v8 }
  0x5f   : > { %1252 = vmatmul.mubr.msk.bf16.gmra.mxu1 %vm473_vm2, %v794_v9  ;;  %1229 = vmatprep.mubr.msk.bf16.mxu0 %vm1347_vm0, %v1346_v0 }
  0x66   : > { %1230 = vmatmul.mubr.msk.bf16.gmra.mxu0 %vm473_vm2, %v679_v13 }
  0xd7   : > { %v613_v14 = vpop.f32.mrf.mxu1 }
  0xd9   : > { %v1193_v15 = vpop.f32.mrf.mxu1 }
  0xdb   : > { %v616_v16 = vpop.f32.mrf.mxu1 }
  0xdd   : > { %v1194_v17 = vpop.f32.mrf.mxu1 }
  0xde   : > { %v527_v18 = vpop.f32.mrf.mxu0 }
  0xdf   : > { %v621_v19 = vpop.f32.mrf.mxu1  ;;  %v614_v20 = vadd.f32 %v613_v14, %v527_v18 }
  0xe0   : > { %v1171_v21 = vpop.f32.mrf.mxu0 }
  0xe1   : > { %v1197_v22 = vpop.f32.mrf.mxu1 }
  0xe2   : > { %v530_v23 = vpop.f32.mrf.mxu0 }
  0xe3   : > { %v624_v24 = vpop.f32.mrf.mxu1  ;;  %v617_v25 = vadd.f32 %v616_v16, %v530_v23 }
  0xe4   : > { %v1172_v26 = vpop.f32.mrf.mxu0 }
  0xe5   : > { %v1198_v27 = vpop.f32.mrf.mxu1 }
  0xe6   : > { %v535_v0 = vpop.f32.mrf.mxu0 }
  0xe7   : > { %v629_v28 = vpop.f32.mrf.mxu1  ;;  %v622_v29 = vadd.f32 %v621_v19, %v535_v0 }
  0xe8   : > { %v1175_v30 = vpop.f32.mrf.mxu0 }
  0xe9   : > { %v1201_v31 = vpop.f32.mrf.mxu1 }
  0xea   : > { %v538_v32 = vpop.f32.mrf.mxu0 }
  0xeb   : > { %v632_v33 = vpop.f32.mrf.mxu1  ;;  %v625_v14 = vadd.f32 %v624_v24, %v538_v32 }
  0xec   : > { %v1176_v34 = vpop.f32.mrf.mxu0 }
  0xed   : > { %v1202_v35 = vpop.f32.mrf.mxu1 }
  0xee   : > { %v543_v36 = vpop.f32.mrf.mxu0 }
  0xef   : > { %v637_v37 = vpop.f32.mrf.mxu1  ;;  %v630_v21 = vadd.f32 %v629_v28, %v543_v36 }
  0xf0   : > { %v1179_v38 = vpop.f32.mrf.mxu0 }
  0xf1   : > { %v1205_v39 = vpop.f32.mrf.mxu1 }
  0xf2   : > { %v546_v40 = vpop.f32.mrf.mxu0 }
  0xf3   : > { %v1555_v41 = vpop.f32.mrf.mxu1  ;;  %v633_v30 = vadd.f32 %v632_v33, %v546_v40 }
  0xf4   : > { %v1180_v42 = vpop.f32.mrf.mxu0 }
  0xf5   : > { %v1206_v43 = vpop.f32.mrf.mxu1 }
  0xf6   : > { %v551_v44 = vpop.f32.mrf.mxu0 }
  0xf7   : > { %v1557_v45 = vpop.f32.mrf.mxu1  ;;  %v638_v38 = vadd.f32 %v637_v37, %v551_v44 }
  0xf8   : > { %v1183_v46 = vpop.f32.mrf.mxu0 }
  0xf9   : > { %v1209_v47 = vpop.f32.mrf.mxu1 }
  0xfa   : > { %v554_v48 = vpop.f32.mrf.mxu0 }
  0xfb   : > { %v1559_v49 = vpop.f32.mrf.mxu1  ;;  %v641_v47 = vadd.f32 %v1555_v41, %v554_v48 }
  0xfc   : > { %v1184_v50 = vpop.f32.mrf.mxu0 }
  0xfd   : > { %v1210_v51 = vpop.f32.mrf.mxu1 }
  0xfe   : > { %v559_v52 = vpop.f32.mrf.mxu0 }
  0xff   : > { %v847_v53 = vpop.f32.mrf.mxu1 }
 0x100   : > { %v1187_v54 = vpop.f32.mrf.mxu0 }
 0x101   : > { %v1237_v55 = vpop.f32.mrf.mxu1 }
 0x102   : > { %v562_v56 = vpop.f32.mrf.mxu0  ;;  %v646_v55 = vadd.f32 %v1557_v45, %v559_v52 }
 0x103   : > { %v850_v57 = vpop.f32.mrf.mxu1 }
 0x104   : > { %v1188_v58 = vpop.f32.mrf.mxu0 }
 0x105   : > { %v1238_v59 = vpop.f32.mrf.mxu1 }
 0x106   : > { %v732_v60 = vpop.f32.mrf.mxu0  ;;  %v649_v59 = vadd.f32 %v1559_v49, %v562_v56 }
 0x107   : > { %v855_v61 = vpop.f32.mrf.mxu1  ;;  %v771_v62 = vadd.f32 %v732_v60, %v614_v20 }
 0x108   : > { %v1215_v63 = vpop.f32.mrf.mxu0 }
 0x109   : > { %v1241_v1 = vpop.f32.mrf.mxu1  ;;  %v1561_v2 = vadd.f32 %v847_v53, %v771_v62 }
 0x10a   : > { %v735_v3 = vpop.f32.mrf.mxu0 }
 0x10b   : > { %v858_v4 = vpop.f32.mrf.mxu1  ;;  %v772_v5 = vadd.f32 %v735_v3, %v617_v25 }
 0x10c   : > { %v1216_v6 = vpop.f32.mrf.mxu0 }
 0x10d   : > { %v1242_v7 = vpop.f32.mrf.mxu1  ;;  %v1563_v8 = vadd.f32 %v850_v57, %v772_v5 }
 0x10e   : > { %v740_v9 = vpop.f32.mrf.mxu0 }
 0x10f   : > { %v863_v10 = vpop.f32.mrf.mxu1  ;;  %v773_v11 = vadd.f32 %v740_v9, %v622_v29 }
 0x110   : > { %v1219_v12 = vpop.f32.mrf.mxu0 }
 0x111   : > { %v1245_v13 = vpop.f32.mrf.mxu1  ;;  %v1565_v15 = vadd.f32 %v855_v61, %v773_v11 }
 0x112   : > { %v743_v16 = vpop.f32.mrf.mxu0 }
 0x113   : > { %v866_v17 = vpop.f32.mrf.mxu1  ;;  %v774_v18 = vadd.f32 %v743_v16, %v625_v14 }
 0x114   : > { %v1220_v19 = vpop.f32.mrf.mxu0 }
 0x115   : > { %v1246_v20 = vpop.f32.mrf.mxu1  ;;  %v1567_v22 = vadd.f32 %v858_v4, %v774_v18 }
 0x116   : > { %v748_v23 = vpop.f32.mrf.mxu0 }
 0x117   : > { %v871_v25 = vpop.f32.mrf.mxu1  ;;  %v775_v26 = vadd.f32 %v748_v23, %v630_v21 }
 0x118   : > { %v1223_v27 = vpop.f32.mrf.mxu0 }
 0x119   : > { %v1249_v0 = vpop.f32.mrf.mxu1  ;;  %v1569_v29 = vadd.f32 %v863_v10, %v775_v26 }
 0x11a   : > { %v751_v31 = vpop.f32.mrf.mxu0 }
 0x11b   : > { %v874_v24 = vpop.f32.mrf.mxu1  ;;  %v776_v32 = vadd.f32 %v751_v31, %v633_v30 }
 0x11c   : > { %v1224_v34 = vpop.f32.mrf.mxu0 }
 0x11d   : > { %v1250_v35 = vpop.f32.mrf.mxu1  ;;  %v1571_v39 = vadd.f32 %v866_v17, %v776_v32 }
 0x11e   : > { %v756_v42 = vpop.f32.mrf.mxu0 }
 0x11f   : > { %v879_v28 = vpop.f32.mrf.mxu1  ;;  %v777_v36 = vadd.f32 %v756_v42, %v638_v38 }
 0x120   : > { %v1227_v43 = vpop.f32.mrf.mxu0 }
 0x121   : > { %v1253_v46 = vpop.f32.mrf.mxu1  ;;  %v1574_v50 = vadd.f32 %v871_v25, %v777_v36 }
 0x122   : > { %v759_v33 = vpop.f32.mrf.mxu0 }
 0x123   : > { %v882_v40 = vpop.f32.mrf.mxu1  ;;  %v778_v51 = vadd.f32 %v759_v33, %v641_v47 }
 0x124   : > { %v1228_v53 = vpop.f32.mrf.mxu0 }
 0x125   : > { %v1254_v54 = vpop.f32.mrf.mxu1  ;;  %v893_v57 = vadd.f32 %v874_v24, %v778_v51 }
 0x126   : > { %v764_v37 = vpop.f32.mrf.mxu0 }
 0x127   : > { %v779_v44 = vadd.f32 %v764_v37, %v646_v55 }
 0x128   : > { %v1231_v58 = vpop.f32.mrf.mxu0 }
 0x129   : > { %v894_v60 = vadd.f32 %v879_v28, %v779_v44  ;;  %899 = sbr.rel (%p1137_p7) target bundleno = 310 (0x136), region = 40 }
 0x12a   : > { %v767_v61 = vpop.f32.mrf.mxu0 }
 0x12b   : > { %v780_v62 = vadd.f32 %v767_v61, %v649_v59 }
 0x12c   : > { %v1232_v63 = vpop.f32.mrf.mxu0 }
 0x12d   : > { %v895_v41 = vadd.f32 %v882_v40, %v780_v62 }
 0x12e   : > { %v1138_v45 = vld [vmem:[%s1665_s3] ss:$0 sm:$0xff]  ;;  %vm917_vm6 = vcmask 64512  }
 0x12f   : > { %v907_v48 = vadd.f32 %v1138_v45, %v1561_v2  ;;  %v908_v49 = vadd.f32 %v1138_v45, %v1563_v8  ;;  %v909_v52 = vadd.f32 %v1138_v45, %v1565_v15  ;;  %v910_v56 = vadd.f32 %v1138_v45, %v1567_v22 }
 0x130   : > { %v911_v1 = vadd.f32 %v1138_v45, %v1569_v29  ;;  %v912_v3 = vadd.f32 %v1138_v45, %v1571_v39  ;;  %v913_v4 = vadd.f32 %v1138_v45, %v1574_v50  ;;  %v914_v5 = vadd.f32 %v1138_v45, %v893_v57 }
 0x131   : > { %918 = vst.msk [vmem:[%s1438_s23] sm:$0xff] %vm917_vm6, %v907_v48  ;;  %919 = vst.msk [vmem:[%s1438_s23 + $0x8] sm:$0xff] %vm917_vm6, %v908_v49  ;;  %v915_v6 = vadd.f32 %v1138_v45, %v894_v60  ;;  %v916_v7 = vadd.f32 %v1138_v45, %v895_v41 }
 0x132   : > { %920 = vst.msk [vmem:[%s1438_s23 + $0x10] sm:$0xff] %vm917_vm6, %v909_v52  ;;  %921 = vst.msk [vmem:[%s1438_s23 + $0x18] sm:$0xff] %vm917_vm6, %v910_v56 }
 0x133   : > { %922 = vst.msk [vmem:[%s1438_s23 + $0x20] sm:$0xff] %vm917_vm6, %v911_v1  ;;  %923 = vst.msk [vmem:[%s1438_s23 + $0x28] sm:$0xff] %vm917_vm6, %v912_v3 }
 0x134   : > { %924 = vst.msk [vmem:[%s1438_s23 + $0x30] sm:$0xff] %vm917_vm6, %v913_v4  ;;  %925 = vst.msk [vmem:[%s1438_s23 + $0x38] sm:$0xff] %vm917_vm6, %v914_v5 }
 0x135   : > { %926 = vst.msk [vmem:[%s1438_s23 + $0x40] sm:$0xff] %vm917_vm6, %v915_v6  ;;  %927 = vst.msk [vmem:[%s1438_s23 + $0x48] sm:$0xff] %vm917_vm6, %v916_v7 }
 0x136 PF: > { %p1139_p8 = scmp.eq.s32.totalorder %s1328_s15, 0 }
 0x138   : > { %931 = sbr.rel (%p1139_p8) target bundleno = 325 (0x145), region = 44 }
 0x13d   : > { %v932_v9 = vld [vmem:[%s1438_s23] sm:$0xff]  ;;  %vm952_vm7 = vcmask 64512   ;;  %v933_v10 = vld [vmem:[%s1438_s23 + $0x8] sm:$0xff]  ;;  %v934_v11 = vld [vmem:[%s1438_s23 + $0x10] sm:$0xff] }
 0x13e   : > { %v942_v12 = vadd.f32 %v932_v9, %v1561_v2  ;;  %v943_v13 = vadd.f32 %v933_v10, %v1563_v8  ;;  %v944_v14 = vadd.f32 %v934_v11, %v1565_v15  ;;  %v935_v16 = vld [vmem:[%s1438_s23 + $0x18] sm:$0xff]  ;;  %v936_v17 = vld [vmem:[%s1438_s23 + $0x20] sm:$0xff]  ;;  %v937_v18 = vld [vmem:[%s1438_s23 + $0x28] sm:$0xff] }
 0x13f   : > { %v945_v19 = vadd.f32 %v935_v16, %v1567_v22  ;;  %v946_v20 = vadd.f32 %v936_v17, %v1569_v29  ;;  %v947_v21 = vadd.f32 %v937_v18, %v1571_v39  ;;  %v938_v2 = vld [vmem:[%s1438_s23 + $0x30] sm:$0xff]  ;;  %v939_v8 = vld [vmem:[%s1438_s23 + $0x38] sm:$0xff]  ;;  %v940_v15 = vld [vmem:[%s1438_s23 + $0x40] sm:$0xff] }
 0x140   : > { %953 = vst.msk [vmem:[%s1438_s23] sm:$0xff] %vm952_vm7, %v942_v12  ;;  %954 = vst.msk [vmem:[%s1438_s23 + $0x8] sm:$0xff] %vm952_vm7, %v943_v13  ;;  %v948_v23 = vadd.f32 %v938_v2, %v1574_v50  ;;  %v949_v22 = vadd.f32 %v939_v8, %v893_v57  ;;  %v950_v25 = vadd.f32 %v940_v15, %v894_v60  ;;  %v941_v26 = vld [vmem:[%s1438_s23 + $0x48] sm:$0xff] }
 0x141   : > { %955 = vst.msk [vmem:[%s1438_s23 + $0x10] sm:$0xff] %vm952_vm7, %v944_v14  ;;  %956 = vst.msk [vmem:[%s1438_s23 + $0x18] sm:$0xff] %vm952_vm7, %v945_v19  ;;  %v951_v27 = vadd.f32 %v941_v26, %v895_v41 }
 0x142   : > { %957 = vst.msk [vmem:[%s1438_s23 + $0x20] sm:$0xff] %vm952_vm7, %v946_v20  ;;  %958 = vst.msk [vmem:[%s1438_s23 + $0x28] sm:$0xff] %vm952_vm7, %v947_v21 }
 0x143   : > { %959 = vst.msk [vmem:[%s1438_s23 + $0x30] sm:$0xff] %vm952_vm7, %v948_v23  ;;  %960 = vst.msk [vmem:[%s1438_s23 + $0x38] sm:$0xff] %vm952_vm7, %v949_v22 }
 0x144   : > { %961 = vst.msk [vmem:[%s1438_s23 + $0x40] sm:$0xff] %vm952_vm7, %v950_v25  ;;  %962 = vst.msk [vmem:[%s1438_s23 + $0x48] sm:$0xff] %vm952_vm7, %v951_v27 }
 0x145 PF: > { %s14_s19 = sadd.s32 1, %s1344_s19   ;;  %s1667_s15 = smov %s1336_s17 }
 0x146   : > { %p11_p9 = scmp.ge.s32.totalorder %s14_s19, 10   ;;  %s1668_s16 = smov %s1340_s18 }
 0x147   : > { %s1669_s17 = smov %s1672_s20  ;;  %s1670_s18 = smov %s1676_s21 }
 0x148   :  { %13 = sbr.rel (!%p11_p9) target bundleno = 3 (0x3), region = 83 }

</bundles_post_ra>
